<compile_context>
chip_gen: v7x
topology: tpu7x:2x2x1
jax: 0.10.0
libtpu: 0.0.40
codegen_flags: <defaults>
</compile_context>

<pallas_src>
import functools

import jax
import jax.numpy as jnp
from jax.experimental import pallas as pl
from jax.experimental.pallas import tpu as pltpu

D_IN = 512     # backbone / MLP hidden width
D_HID = 512    # first Linear output width
D_OUT = 128    # second Linear output width


def _round_up(n, m):
    return (n + m - 1) // m * m


def reconstitution_kernel(x_ref, y_ref, z_ref,
                          w1_ref, b1_ref, w2_ref, b2_ref,
                          o_ref):
    # Placeholder backbone: fuse the three f32 inputs elementwise (VPU), then
    # cast once to bf16 for the MXU (avoids bf16 add widening on v5e).
    feat = (x_ref[...] + y_ref[...] + z_ref[...]).astype(jnp.bfloat16)  # (TB, 512)

    # Linear(512, 512) + bias + ReLU.  bf16 x bf16 MXU, f32 accumulate.
    h = jnp.dot(feat, w1_ref[...], preferred_element_type=jnp.float32)
    h = jnp.maximum(h + b1_ref[...], 0.0)                               # (TB, 512)

    # Linear(512, 128) + bias.  128-wide output -> lane-dense stores.
    out = jnp.dot(h.astype(jnp.bfloat16), w2_ref[...],
                  preferred_element_type=jnp.float32)
    o_ref[...] = (out + b2_ref[...]).astype(o_ref.dtype)                # (TB, 128)


@functools.partial(jax.jit, static_argnames=("tb",))
def reconstitution_forward(x, y, z, w1, b1, w2, b2, *, tb=1024):
    B = x.shape[0]

    # Batch tile: big enough to amortize per-grid-step overhead, 8-aligned.
    TB = min(tb, _round_up(B, 8))
    # v7x has 2 TensorCores: make sure the "parallel" batch axis has >= 2 grid
    # steps whenever B allows it, instead of one tile swallowing the batch.
    if B > 8 and pl.cdiv(B, TB) < 2:
        TB = max(8, _round_up(pl.cdiv(B, 2), 8))
    grid = (pl.cdiv(B, TB),)

    # Weights should already be bf16 (cast once at init); these are no-ops then.
    w1 = w1.astype(jnp.bfloat16)
    w2 = w2.astype(jnp.bfloat16)
    b1 = b1.astype(jnp.float32).reshape(1, D_HID)
    b2 = b2.astype(jnp.float32).reshape(1, D_OUT)

    rows = grid[0] * TB  # rows actually processed (incl. masked edge rows)
    cost = pl.CostEstimate(
        flops=2 * rows * D_IN * (D_HID + D_OUT),
        transcendentals=0,
        bytes_accessed=(3 * B * D_IN * 4                      # x, y, z (f32)
                        + (D_IN * D_HID + D_HID * D_OUT) * 2  # weights (bf16)
                        + (D_HID + D_OUT) * 4                 # biases (f32)
                        + B * D_OUT * 4))                     # output (f32)

    out = pl.pallas_call(
        reconstitution_kernel,
        out_shape=jax.ShapeDtypeStruct((B, D_OUT), jnp.float32),
        grid_spec=pltpu.PrefetchScalarGridSpec(
            num_scalar_prefetch=0,
            grid=grid,
            in_specs=[
                pl.BlockSpec((TB, D_IN), lambda i: (i, 0)),       # x (f32)
                pl.BlockSpec((TB, D_IN), lambda i: (i, 0)),       # y (f32)
                pl.BlockSpec((TB, D_IN), lambda i: (i, 0)),       # z (f32)
                pl.BlockSpec((D_IN, D_HID), lambda i: (0, 0)),    # w1 (resident)
                pl.BlockSpec((1, D_HID), lambda i: (0, 0)),       # b1 (resident)
                pl.BlockSpec((D_HID, D_OUT), lambda i: (0, 0)),   # w2 (resident)
                pl.BlockSpec((1, D_OUT), lambda i: (0, 0)),       # b2 (resident)
            ],
            out_specs=pl.BlockSpec((TB, D_OUT), lambda i: (i, 0)),
        ),
        compiler_params=pltpu.CompilerParams(
            dimension_semantics=("parallel",),     # v7x: shard batch across TCs
            vmem_limit_bytes=48 * 1024 * 1024),    # covers TB=1024 f32 tiles
        cost_estimate=cost,
    )(x, y, z, w1, b1, w2, b2)

    return out


def reference_forward_f32(x, y, z, w1, b1, w2, b2):
    feat = x + y + z
    h = jnp.maximum(feat @ w1 + b1, 0.0)
    return h @ w2 + b2


def reference_forward_bf16(x, y, z, w1, b1, w2, b2):
    # Mirrors the kernel's numerics: f32 fusion, bf16 matmul inputs, f32 acc.
    bf = jnp.bfloat16
    feat = (x + y + z).astype(bf)
    h = jnp.dot(feat, w1.astype(bf), preferred_element_type=jnp.float32) + b1
    h = jnp.maximum(h, 0.0)
    out = jnp.dot(h.astype(bf), w2.astype(bf),
                  preferred_element_type=jnp.float32) + b2
    return out


if __name__ == "__main__":
    key = jax.random.PRNGKey(0)
    kx, ky, kz, kw1, kb1, kw2, kb2 = jax.random.split(key, 7)

    # Deterministic MLP parameters (shapes from nn.Linear(512,512)/(512,128)).
    # Stored as (in, out) so the kernel does feat @ W (PyTorch applies x @ W.T
    # on its (out, in) weight — same math).
    w1_f32 = jax.random.normal(kw1, (D_IN, D_HID), dtype=jnp.float32) * 0.02
    b1 = jax.random.normal(kb1, (1, D_HID), dtype=jnp.float32) * 0.02
    w2_f32 = jax.random.normal(kw2, (D_HID, D_OUT), dtype=jnp.float32) * 0.02
    b2 = jax.random.normal(kb2, (1, D_OUT), dtype=jnp.float32) * 0.02

    # Cast weights to bf16 once, outside the jitted forward (hoisted per review).
    w1 = w1_f32.astype(jnp.bfloat16)
    w2 = w2_f32.astype(jnp.bfloat16)

    # Tiny batch + a ragged batch (exercises partial-last-block + grid>=2 path).
    for B in (8, 260):
        kxb, kyb, kzb = jax.random.split(jax.random.fold_in(kx, B), 3)
        x = jax.random.normal(kxb, (B, D_IN), dtype=jnp.float32)
        y = jax.random.normal(kyb, (B, D_IN), dtype=jnp.float32)
        z = jax.random.normal(kzb, (B, D_IN), dtype=jnp.float32)

        out = jax.block_until_ready(
            reconstitution_forward(x, y, z, w1, b1, w2, b2))
        assert out.shape == (B, D_OUT), out.shape

        # Match against a reference with the same bf16/f32-acc numerics.
        ref_bf16 = reference_forward_bf16(x, y, z, w1_f32, b1, w2_f32, b2)
        assert jnp.allclose(out, ref_bf16, atol=2e-3, rtol=2e-3), \
            float(jnp.max(jnp.abs(out - ref_bf16)))

        # Sanity check against the full-f32 reference (loosened for bf16).
        ref_f32 = reference_forward_f32(x, y, z, w1_f32, b1, w2_f32, b2)
        assert jnp.allclose(out, ref_f32, atol=5e-2, rtol=5e-2), \
            float(jnp.max(jnp.abs(out - ref_f32)))

    print("KERNEL_OK")
</pallas_src>

<mosaic_0001>
module attributes {stable_mosaic.version = 11 : i64} {
  func.func @reconstitution_kernel(%arg0: i32, %arg1: memref<8x512xf32, #tpu.memory_space<vmem>>, %arg2: memref<8x512xf32, #tpu.memory_space<vmem>>, %arg3: memref<8x512xf32, #tpu.memory_space<vmem>>, %arg4: memref<512x512xbf16, #tpu.memory_space<vmem>>, %arg5: memref<1x512xf32, #tpu.memory_space<vmem>>, %arg6: memref<512x128xbf16, #tpu.memory_space<vmem>>, %arg7: memref<1x128xf32, #tpu.memory_space<vmem>>, %arg8: memref<8x128xf32, #tpu.memory_space<vmem>>) attributes {dimension_semantics = [#tpu.dimension_semantics<parallel>], iteration_bounds = array<i64: 1>, scalar_prefetch = 0 : i64, scratch_operands = 0 : i64, tpu.core_type = #tpu.core_type<tc>, window_params = [{transform_indices = @transform_0, window_bounds = array<i64: 8, 512>}, {transform_indices = @transform_1, window_bounds = array<i64: 8, 512>}, {transform_indices = @transform_2, window_bounds = array<i64: 8, 512>}, {pipeline_mode = #tpu.pipeline_mode<synchronous>, transform_indices = @transform_3, window_bounds = array<i64: 512, 512>}, {pipeline_mode = #tpu.pipeline_mode<synchronous>, transform_indices = @transform_4, window_bounds = array<i64: 1, 512>}, {pipeline_mode = #tpu.pipeline_mode<synchronous>, transform_indices = @transform_5, window_bounds = array<i64: 512, 128>}, {pipeline_mode = #tpu.pipeline_mode<synchronous>, transform_indices = @transform_6, window_bounds = array<i64: 1, 128>}, {transform_indices = @transform_7, window_bounds = array<i64: 8, 128>}]} {
    %c0 = arith.constant 0 : index
    %c0_0 = arith.constant 0 : index
    %0 = vector.load %arg1[%c0, %c0_0] : memref<8x512xf32, #tpu.memory_space<vmem>>, vector<8x512xf32>
    %c0_1 = arith.constant 0 : index
    %c0_2 = arith.constant 0 : index
    %1 = vector.load %arg2[%c0_1, %c0_2] : memref<8x512xf32, #tpu.memory_space<vmem>>, vector<8x512xf32>
    %2 = arith.addf %0, %1 : vector<8x512xf32>
    %c0_3 = arith.constant 0 : index
    %c0_4 = arith.constant 0 : index
    %3 = vector.load %arg3[%c0_3, %c0_4] : memref<8x512xf32, #tpu.memory_space<vmem>>, vector<8x512xf32>
    %4 = arith.addf %2, %3 : vector<8x512xf32>
    %5 = arith.truncf %4 : vector<8x512xf32> to vector<8x512xbf16>
    %c0_5 = arith.constant 0 : index
    %c0_6 = arith.constant 0 : index
    %6 = vector.load %arg4[%c0_5, %c0_6] : memref<512x512xbf16, #tpu.memory_space<vmem>>, vector<512x512xbf16>
    %cst = arith.constant dense<0.000000e+00> : vector<8x512xf32>
    %7 = tpu.matmul %5, %6, %cst {dimension_numbers = #tpu.dot_dimension_numbers<[1], [0], [0], [1], [0, 0, 1, 1], [], []>} : vector<8x512xbf16>, vector<512x512xbf16>, vector<8x512xf32> -> vector<8x512xf32>
    %c0_7 = arith.constant 0 : index
    %c0_8 = arith.constant 0 : index
    %8 = vector.load %arg5[%c0_7, %c0_8] : memref<1x512xf32, #tpu.memory_space<vmem>>, vector<1x512xf32>
    %9 = vector.broadcast %8 : vector<1x512xf32> to vector<8x512xf32>
    %10 = arith.addf %7, %9 : vector<8x512xf32>
    %cst_9 = arith.constant 0.000000e+00 : f32
    %11 = vector.broadcast %cst_9 : f32 to vector<8x512xf32>
    %12 = arith.maximumf %10, %11 : vector<8x512xf32>
    %13 = arith.truncf %12 : vector<8x512xf32> to vector<8x512xbf16>
    %c0_10 = arith.constant 0 : index
    %c0_11 = arith.constant 0 : index
    %14 = vector.load %arg6[%c0_10, %c0_11] : memref<512x128xbf16, #tpu.memory_space<vmem>>, vector<512x128xbf16>
    %cst_12 = arith.constant dense<0.000000e+00> : vector<8x128xf32>
    %15 = tpu.matmul %13, %14, %cst_12 {dimension_numbers = #tpu.dot_dimension_numbers<[1], [0], [0], [1], [0, 0, 1, 1], [], []>} : vector<8x512xbf16>, vector<512x128xbf16>, vector<8x128xf32> -> vector<8x128xf32>
    %c0_13 = arith.constant 0 : index
    %c0_14 = arith.constant 0 : index
    %16 = vector.load %arg7[%c0_13, %c0_14] : memref<1x128xf32, #tpu.memory_space<vmem>>, vector<1x128xf32>
    %17 = vector.broadcast %16 : vector<1x128xf32> to vector<8x128xf32>
    %18 = arith.addf %15, %17 : vector<8x128xf32>
    %c0_15 = arith.constant 0 : index
    %c0_16 = arith.constant 0 : index
    %19 = vector.load %arg8[%c0_15, %c0_16] : memref<8x128xf32, #tpu.memory_space<vmem>>, vector<8x128xf32>
    tpu.vector_store %arg8[%c0_15, %c0_16], %18 {strides = array<i32>} : memref<8x128xf32, #tpu.memory_space<vmem>>, vector<8x128xf32>,
    return
  }
  func.func @transform_0(%arg0: i32) -> (i32, i32) {
    %c0_i32 = arith.constant 0 : i32
    %c0_i32_0 = arith.constant 0 : i32
    return %arg0, %c0_i32 : i32, i32
  }
  func.func @transform_1(%arg0: i32) -> (i32, i32) {
    %c0_i32 = arith.constant 0 : i32
    %c0_i32_0 = arith.constant 0 : i32
    return %arg0, %c0_i32 : i32, i32
  }
  func.func @transform_2(%arg0: i32) -> (i32, i32) {
    %c0_i32 = arith.constant 0 : i32
    %c0_i32_0 = arith.constant 0 : i32
    return %arg0, %c0_i32 : i32, i32
  }
  func.func @transform_3(%arg0: i32) -> (i32, i32) {
    %c0_i32 = arith.constant 0 : i32
    %c0_i32_0 = arith.constant 0 : i32
    %c0_i32_1 = arith.constant 0 : i32
    return %c0_i32, %c0_i32_0 : i32, i32
  }
  func.func @transform_4(%arg0: i32) -> (i32, i32) {
    %c0_i32 = arith.constant 0 : i32
    %c0_i32_0 = arith.constant 0 : i32
    %c0_i32_1 = arith.constant 0 : i32
    return %c0_i32, %c0_i32_0 : i32, i32
  }
  func.func @transform_5(%arg0: i32) -> (i32, i32) {
    %c0_i32 = arith.constant 0 : i32
    %c0_i32_0 = arith.constant 0 : i32
    %c0_i32_1 = arith.constant 0 : i32
    return %c0_i32, %c0_i32_0 : i32, i32
  }
  func.func @transform_6(%arg0: i32) -> (i32, i32) {
    %c0_i32 = arith.constant 0 : i32
    %c0_i32_0 = arith.constant 0 : i32
    %c0_i32_1 = arith.constant 0 : i32
    return %c0_i32, %c0_i32_0 : i32, i32
  }
  func.func @transform_7(%arg0: i32) -> (i32, i32) {
    %c0_i32 = arith.constant 0 : i32
    %c0_i32_0 = arith.constant 0 : i32
    return %arg0, %c0_i32 : i32, i32
  }
}

</mosaic_0001>

<bundles_post_ra>
// kernel: reconstitution_forward.1
= control target key start
LH: loop header
LB: loop body
LE: loop exit
PB: predicated region body
PF: predicated region fallthrough
CT: control target
= control target key end

     0   :  { %12 = vsyncpa [#allocation3], 0  ;;  %s2163_s0 = inlined_call_operand.hbm [shape: f32[8,512], index: 0, kind: input, shape index: {}]   ;;  %s2164_s1 = inlined_call_operand.hbm [shape: f32[8,512], index: 1, kind: input, shape index: {}]   ;;  %s2165_s2 = inlined_call_operand.hbm [shape: f32[8,512], index: 2, kind: input, shape index: {}]   ;;  %s2166_s3 = inlined_call_operand.hbm [shape: bf16[512,512], index: 3, kind: input, shape index: {}]   ;;  %s2167_s4 = inlined_call_operand.vmem [shape: f32[1,512], index: 4, kind: input, shape index: {}]   ;;  %s2168_s5 = inlined_call_operand.hbm [shape: bf16[512,128], index: 5, kind: input, shape index: {}]   ;;  %s2169_s6 = inlined_call_operand.vmem [shape: f32[1,128], index: 6, kind: input, shape index: {}]   ;;  %s2170_s7 = inlined_call_operand.hbm [shape: f32[8,128], index: 7, kind: output, shape index: {}]  }
   0x1   :  { %13 = vsyncpa [#allocation6], 0 }
   0x2   :  { %14 = vsyncpa [#allocation9], 0 }
   0x3   :  { %15 = vsyncpa [#allocation4], 0  ;;  %s2028_s24 = smov [#allocation5]   ;;  %s2029_s26 = smov [#allocation8]  }
   0x4   :  { %s32_s25 = sshll.u32 %s2028_s24, 4  ;;  %s51_s27 = sshll.u32 %s2029_s26, 4  ;;  %s33_s25 = int_to_ptr.vmem [resolvable:$true] %s32_s25  ;;  %s2078_s27 = int_to_ptr.vmem [resolvable:$true] %s51_s27 }
   0x5   :  { %s1888_s30 = scalar_lea.hbm %s2164_s1, 512 }
   0x6   :  { %p1889_p0 = scmp.ne.s32.totalorder %s2164_s1, %s1888_s30  ;;  %p1892_p1 = scmp.lt.u32.totalorder %s1888_s30, %s2164_s1 }
   0x8   :  { %p1894_p2 = pnand %p1892_p1, %p1889_p0 }
   0xa   :  { %1897 = shalt.err (!%p1894_p2)
}
   0xb   :  { %s1898_s12 = scalar_lea.vmem %s33_s25, 512  ;;  %p1903_p4 = scmp.lt.s32.totalorder %s33_s25, %s33_s25 }
   0xc   :  { %p1899_p3 = scmp.ne.s32.totalorder %s33_s25, %s1898_s12  ;;  %p1904_p5 = scmp.lt.s32.totalorder %s1898_s12, %s1898_s12 }
   0xe   :  { %p1905_p6 = por %p1904_p5, %p1903_p4 }
  0x10   :  { %p1906_p7 = pnand %p1905_p6, %p1899_p3 }
  0x12   :  { %1909 = shalt.err (!%p1906_p7)
}
  0x13   :  { %35 = dma.hbm_to_vmem [thread:$0]  %s2164_s1, 512, %s33_s25, [#allocation6]  }
  0x14   :  { %s1910_s17 = scalar_lea.hbm %s2166_s3, 16384 }
  0x15   :  { %p1911_p8 = scmp.ne.s32.totalorder %s2166_s3, %s1910_s17  ;;  %p1914_p9 = scmp.lt.u32.totalorder %s1910_s17, %s2166_s3 }
  0x17   :  { %p1916_p10 = pnand %p1914_p9, %p1911_p8 }
  0x19   :  { %1919 = shalt.err (!%p1916_p10)
}
  0x1a   :  { %s1920_s22 = scalar_lea.vmem %s2078_s27, 16384  ;;  %p1925_p12 = scmp.lt.s32.totalorder %s2078_s27, %s2078_s27 }
  0x1b   :  { %p1921_p11 = scmp.ne.s32.totalorder %s2078_s27, %s1920_s22  ;;  %p1926_p13 = scmp.lt.s32.totalorder %s1920_s22, %s1920_s22 }
  0x1d   :  { %p1927_p0 = por %p1926_p13, %p1925_p12 }
  0x1f   :  { %p1928_p1 = pnand %p1927_p0, %p1921_p11 }
  0x21   :  { %1931 = shalt.err (!%p1928_p1)
}
  0x22   :  { %s2030_s1 = smov 256   ;;  %s2031_s23 = smov 16  }
  0x23   :  { %57 = dma.hbm_to_vmem [thread:$0]  %s2166_s3, 16384, %s2078_s27, [#allocation9], %s2030_s1, %s2030_s1, %s2031_s23  }
  0x24   :  { %s2032_s26 = smov [#allocation2]   ;;  %s2033_s29 = smov [#allocation7]  }
  0x25   :  { %s22_s28 = sshll.u32 %s2032_s26, 4  ;;  %s42_s30 = sshll.u32 %s2033_s29, 4  ;;  %s23_s28 = int_to_ptr.vmem [resolvable:$true] %s22_s28  ;;  %s43_s30 = int_to_ptr.vmem [resolvable:$true] %s42_s30 }
  0x26   :  { %s1932_s10 = scalar_lea.hbm %s2163_s0, 512 }
  0x27   :  { %p1933_p2 = scmp.ne.s32.totalorder %s2163_s0, %s1932_s10  ;;  %p1936_p3 = scmp.lt.u32.totalorder %s1932_s10, %s2163_s0 }
  0x29   :  { %p1938_p4 = pnand %p1936_p3, %p1933_p2 }
  0x2b   :  { %1941 = shalt.err (!%p1938_p4)
}
  0x2c   :  { %s1942_s3 = scalar_lea.vmem %s23_s28, 512  ;;  %p1947_p6 = scmp.lt.s32.totalorder %s23_s28, %s23_s28 }
  0x2d   :  { %p1943_p5 = scmp.ne.s32.totalorder %s23_s28, %s1942_s3  ;;  %p1948_p7 = scmp.lt.s32.totalorder %s1942_s3, %s1942_s3 }
  0x2f   :  { %p1949_p8 = por %p1948_p7, %p1947_p6 }
  0x31   :  { %p1950_p9 = pnand %p1949_p8, %p1943_p5 }
  0x33   :  { %1953 = shalt.err (!%p1950_p9)
}
  0x34   :  { %25 = dma.hbm_to_vmem [thread:$0]  %s2163_s0, 512, %s23_s28, [#allocation3]  }
  0x35   :  { %s1954_s18 = scalar_lea.hbm %s2165_s2, 512 }
  0x36   :  { %p1955_p10 = scmp.ne.s32.totalorder %s2165_s2, %s1954_s18  ;;  %p1958_p11 = scmp.lt.u32.totalorder %s1954_s18, %s2165_s2 }
  0x38   :  { %p1960_p12 = pnand %p1958_p11, %p1955_p10 }
  0x3a   :  { %1963 = shalt.err (!%p1960_p12)
}
  0x3b   :  { %s1964_s1 = scalar_lea.vmem %s43_s30, 512  ;;  %p1969_p0 = scmp.lt.s32.totalorder %s43_s30, %s43_s30 }
  0x3c   :  { %p1965_p13 = scmp.ne.s32.totalorder %s43_s30, %s1964_s1  ;;  %p1970_p1 = scmp.lt.s32.totalorder %s1964_s1, %s1964_s1 }
  0x3e   :  { %p1971_p2 = por %p1970_p1, %p1969_p0 }
  0x40   :  { %p1972_p3 = pnand %p1971_p2, %p1965_p13 }
  0x42   :  { %1975 = shalt.err (!%p1972_p3)
}
  0x43   :  { %45 = dma.hbm_to_vmem [thread:$0]  %s2165_s2, 512, %s43_s30, [#allocation6]  }
  0x44   :  { %s2034_s24 = smov [#allocation10]   ;;  %s1976_s29 = scalar_lea.hbm %s2168_s5, 4096 }
  0x45   :  { %s65_s25 = sshll.u32 %s2034_s24, 4  ;;  %p1977_p4 = scmp.ne.s32.totalorder %s2168_s5, %s1976_s29  ;;  %s66_s25 = int_to_ptr.vmem [resolvable:$true] %s65_s25 }
  0x46   :  { %p1980_p5 = scmp.lt.u32.totalorder %s1976_s29, %s2168_s5 }
  0x48   :  { %p1982_p6 = pnand %p1980_p5, %p1977_p4 }
  0x4a   :  { %1985 = shalt.err (!%p1982_p6)
}
  0x4b   :  { %s1986_s12 = scalar_lea.vmem %s66_s25, 4096  ;;  %p1991_p8 = scmp.lt.s32.totalorder %s66_s25, %s66_s25 }
  0x4c   :  { %p1987_p7 = scmp.ne.s32.totalorder %s66_s25, %s1986_s12  ;;  %p1992_p9 = scmp.lt.s32.totalorder %s1986_s12, %s1986_s12 }
  0x4e   :  { %p1993_p10 = por %p1992_p9, %p1991_p8 }
  0x50   :  { %p1994_p11 = pnand %p1993_p10, %p1987_p7 }
  0x52   :  { %1997 = shalt.err (!%p1994_p11)
}
  0x53   :  { %s2035_s2 = smov 64   ;;  %s2036_s30 = smov 4  }
  0x54   :  { %71 = dma.hbm_to_vmem [thread:$0]  %s2168_s5, 4096, %s66_s25, [#allocation9], %s2035_s2, %s2035_s2, %s2036_s30  }
  0x55   :  { %2020 = dma.done.wait [#allocation3], 512  }
  0x56   :  { %2021 = vsyncadd [#allocation3], 4294966784 }
  0x57   :  { %2022 = dma.done.wait [#allocation6], 1024  }
  0x58   :  { %2023 = vsyncadd [#allocation6], 4294966272 }
  0x59   :  { %2024 = dma.done.wait [#allocation9], 20480  }
  0x5a   :  { %2025 = vsyncadd [#allocation9], 4294946816  ;;  %v1664_v0 = vld [vmem:[#allocation8 + $0x4] ss:$16 sps:$4 sm:$0xff]   ;;  %v1666_v1 = vld [vmem:[#allocation8 + $0xc] ss:$16 sps:$4 sm:$0xff]  }
  0x5b   :  { %904 = vmatprep.subr.bf16.mxu0 %v1664_v0  ;;  %v1668_v2 = vld [vmem:[#allocation8] ss:$16 sps:$4 sm:$0xff]   ;;  %v1669_v3 = vld [vmem:[#allocation8 + $0x8] ss:$16 sps:$4 sm:$0xff]   ;;  %986 = vmatprep.subr.bf16.mxu1 %v1666_v1  ;;  %v1670_v4 = vld [vmem:[#allocation8 + $0x24] ss:$16 sps:$4 sm:$0xff]  }
  0x5c   :  { %905 = vmatpush1.bf16.msra.mxu0 %v1668_v2  ;;  %987 = vmatpush1.bf16.msra.mxu1 %v1669_v3  ;;  %v1672_v5 = vld [vmem:[#allocation8 + $0x2c] ss:$16 sps:$4 sm:$0xff]   ;;  %v1674_v6 = vld [vmem:[#allocation8 + $0x20] ss:$16 sps:$4 sm:$0xff]   ;;  %v1675_v7 = vld [vmem:[#allocation8 + $0x28] ss:$16 sps:$4 sm:$0xff]  }
  0x5d   :  { %906 = vmatprep.subr.bf16.mxu0 %v1670_v4  ;;  %988 = vmatprep.subr.bf16.mxu1 %v1672_v5  ;;  %v1676_v8 = vld [vmem:[#allocation8 + $0x44] ss:$16 sps:$4 sm:$0xff]   ;;  %v1678_v9 = vld [vmem:[#allocation8 + $0x4c] ss:$16 sps:$4 sm:$0xff]   ;;  %v1680_v10 = vld [vmem:[#allocation8 + $0x40] ss:$16 sps:$4 sm:$0xff]  }
  0x5e   :  { %v1681_v11 = vld [vmem:[#allocation8 + $0x48] ss:$16 sps:$4 sm:$0xff]   ;;  %v1682_v12 = vld [vmem:[#allocation8 + $0x64] ss:$16 sps:$4 sm:$0xff]   ;;  %v1684_v13 = vld [vmem:[#allocation8 + $0x6c] ss:$16 sps:$4 sm:$0xff]  }
  0x5f   :  { %v1686_v14 = vld [vmem:[#allocation8 + $0x60] ss:$16 sps:$4 sm:$0xff]   ;;  %v1687_v15 = vld [vmem:[#allocation8 + $0x68] ss:$16 sps:$4 sm:$0xff]   ;;  %v1688_v16 = vld [vmem:[#allocation8 + $0x84] ss:$16 sps:$4 sm:$0xff]  }
  0x60   :  { %907 = vmatpush1.bf16.msra.mxu0 %v1674_v6  ;;  %989 = vmatpush1.bf16.msra.mxu1 %v1675_v7  ;;  %v1690_v17 = vld [vmem:[#allocation8 + $0x8c] ss:$16 sps:$4 sm:$0xff]   ;;  %v1692_v18 = vld [vmem:[#allocation8 + $0x80] ss:$16 sps:$4 sm:$0xff]   ;;  %v1693_v19 = vld [vmem:[#allocation8 + $0x88] ss:$16 sps:$4 sm:$0xff]  }
  0x61   :  { %908 = vmatprep.subr.bf16.mxu0 %v1676_v8  ;;  %990 = vmatprep.subr.bf16.mxu1 %v1678_v9  ;;  %v1694_v20 = vld [vmem:[#allocation8 + $0xa4] ss:$16 sps:$4 sm:$0xff]   ;;  %v1696_v21 = vld [vmem:[#allocation8 + $0xac] ss:$16 sps:$4 sm:$0xff]   ;;  %v1698_v22 = vld [vmem:[#allocation8 + $0xa0] ss:$16 sps:$4 sm:$0xff]  }
  0x62   :  { %v1699_v23 = vld [vmem:[#allocation8 + $0xa8] ss:$16 sps:$4 sm:$0xff]   ;;  %v1700_v24 = vld [vmem:[#allocation8 + $0xc4] ss:$16 sps:$4 sm:$0xff]   ;;  %v1702_v25 = vld [vmem:[#allocation8 + $0xcc] ss:$16 sps:$4 sm:$0xff]  }
  0x63   :  { %v1704_v26 = vld [vmem:[#allocation8 + $0xc0] ss:$16 sps:$4 sm:$0xff]   ;;  %v1705_v27 = vld [vmem:[#allocation8 + $0xc8] ss:$16 sps:$4 sm:$0xff]   ;;  %v1706_v28 = vld [vmem:[#allocation8 + $0xe4] ss:$16 sps:$4 sm:$0xff]  }
  0x64   :  { %909 = vmatpush1.bf16.msra.mxu0 %v1680_v10  ;;  %991 = vmatpush1.bf16.msra.mxu1 %v1681_v11  ;;  %v1708_v29 = vld [vmem:[#allocation8 + $0xec] ss:$16 sps:$4 sm:$0xff]   ;;  %v1710_v30 = vld [vmem:[#allocation8 + $0xe0] ss:$16 sps:$4 sm:$0xff]   ;;  %v1711_v31 = vld [vmem:[#allocation8 + $0xe8] ss:$16 sps:$4 sm:$0xff]  }
  0x65   :  { %910 = vmatprep.subr.bf16.mxu0 %v1682_v12  ;;  %992 = vmatprep.subr.bf16.mxu1 %v1684_v13  ;;  %v1712_v32 = vld [vmem:[#allocation8 + $0x104] ss:$16 sps:$4 sm:$0xff]   ;;  %v1714_v33 = vld [vmem:[#allocation8 + $0x10c] ss:$16 sps:$4 sm:$0xff]   ;;  %v1716_v34 = vld [vmem:[#allocation8 + $0x100] ss:$16 sps:$4 sm:$0xff]  }
  0x66   :  { %v1717_v35 = vld [vmem:[#allocation8 + $0x108] ss:$16 sps:$4 sm:$0xff]   ;;  %v1718_v36 = vld [vmem:[#allocation8 + $0x124] ss:$16 sps:$4 sm:$0xff]   ;;  %v1720_v37 = vld [vmem:[#allocation8 + $0x12c] ss:$16 sps:$4 sm:$0xff]  }
  0x67   :  { %v1722_v38 = vld [vmem:[#allocation8 + $0x120] ss:$16 sps:$4 sm:$0xff]   ;;  %v1723_v39 = vld [vmem:[#allocation8 + $0x128] ss:$16 sps:$4 sm:$0xff]   ;;  %v1724_v40 = vld [vmem:[#allocation8 + $0x144] ss:$16 sps:$4 sm:$0xff]  }
  0x68   :  { %911 = vmatpush1.bf16.msra.mxu0 %v1686_v14  ;;  %993 = vmatpush1.bf16.msra.mxu1 %v1687_v15  ;;  %v1726_v41 = vld [vmem:[#allocation8 + $0x14c] ss:$16 sps:$4 sm:$0xff]   ;;  %v1728_v42 = vld [vmem:[#allocation8 + $0x140] ss:$16 sps:$4 sm:$0xff]   ;;  %v1729_v43 = vld [vmem:[#allocation8 + $0x148] ss:$16 sps:$4 sm:$0xff]  }
  0x69   :  { %912 = vmatprep.subr.bf16.mxu0 %v1688_v16  ;;  %994 = vmatprep.subr.bf16.mxu1 %v1690_v17  ;;  %v1730_v44 = vld [vmem:[#allocation8 + $0x164] ss:$16 sps:$4 sm:$0xff]   ;;  %v1732_v45 = vld [vmem:[#allocation8 + $0x16c] ss:$16 sps:$4 sm:$0xff]   ;;  %v1734_v46 = vld [vmem:[#allocation8 + $0x160] ss:$16 sps:$4 sm:$0xff]  }
  0x6a   :  { %v91_v47 = vld [vmem:[#allocation2 + $0x8] sm:$0xff]  ;;  %v1736_v51 = vld [vmem:[#allocation8 + $0x184] ss:$16 sps:$4 sm:$0xff]   ;;  %v1740_v55 = vld [vmem:[#allocation8 + $0x180] ss:$16 sps:$4 sm:$0xff]   ;;  %s2037_s15 = smov [#allocation11]  }
  0x6b   :  { %v95_v48 = vld [vmem:[#allocation5 + $0x8] sm:$0xff]  ;;  %v1742_v58 = vld [vmem:[#allocation8 + $0x1a4] ss:$16 sps:$4 sm:$0xff]   ;;  %v1746_v60 = vld [vmem:[#allocation8 + $0x1a0] ss:$16 sps:$4 sm:$0xff]   ;;  %s1426_s16 = sshll.u32 %s2037_s15, 4  ;;  %s1427_s16 = int_to_ptr.vmem [resolvable:$true] %s1426_s16 }
  0x6c   :  { %913 = vmatpush1.bf16.msra.mxu0 %v1692_v18  ;;  %995 = vmatpush1.bf16.msra.mxu1 %v1693_v19  ;;  %v103_v49 = vld [vmem:[#allocation7 + $0x8] sm:$0xff]  ;;  %v99_v52 = vadd.f32 %v95_v48, %v91_v47  ;;  %v90_v62 = vld [vmem:[#allocation2] sm:$0xff]  ;;  %s1998_s17 = scalar_lea.vmem %s1427_s16, 128  ;;  %p2003_p13 = scmp.lt.s32.totalorder %s1427_s16, %s1427_s16 }
  0x6d   :  { %914 = vmatprep.subr.bf16.mxu0 %v1694_v20  ;;  %996 = vmatprep.subr.bf16.mxu1 %v1696_v21  ;;  %v1735_v50 = vld [vmem:[#allocation8 + $0x168] ss:$16 sps:$4 sm:$0xff]   ;;  %v1738_v53 = vld [vmem:[#allocation8 + $0x18c] ss:$16 sps:$4 sm:$0xff]   ;;  %v94_v63 = vld [vmem:[#allocation5] sm:$0xff]  ;;  %p1999_p12 = scmp.ne.s32.totalorder %s1427_s16, %s1998_s17  ;;  %p2004_p0 = scmp.lt.s32.totalorder %s1998_s17, %s1998_s17 }
  0x6e   :  { %v107_v54 = vadd.f32 %v103_v49, %v99_v52  ;;  %v1741_v56 = vld [vmem:[#allocation8 + $0x188] ss:$16 sps:$4 sm:$0xff]   ;;  %v1744_v59 = vld [vmem:[#allocation8 + $0x1ac] ss:$16 sps:$4 sm:$0xff]   ;;  %v1748_v0 = vld [vmem:[#allocation8 + $0x1c4] ss:$16 sps:$4 sm:$0xff]   ;;  %v98_v3 = vadd.f32 %v94_v63, %v90_v62 }
  0x6f   :  { %v1747_v61 = vld [vmem:[#allocation8 + $0x1a8] ss:$16 sps:$4 sm:$0xff]   ;;  %v1750_v1 = vld [vmem:[#allocation8 + $0x1cc] ss:$16 sps:$4 sm:$0xff]   ;;  %v1752_v2 = vld [vmem:[#allocation8 + $0x1c0] ss:$16 sps:$4 sm:$0xff]   ;;  %p2005_p1 = por %p2004_p0, %p2003_p13 }
  0x70   :  { %915 = vmatpush1.bf16.msra.mxu0 %v1698_v22  ;;  %997 = vmatpush1.bf16.msra.mxu1 %v1699_v23  ;;  %v111_v57 = vpack.c.bf16 %v107_v54, %v107_v54  ;;  %v1753_v4 = vld [vmem:[#allocation8 + $0x1c8] ss:$16 sps:$4 sm:$0xff]   ;;  %v102_v5 = vld [vmem:[#allocation7] sm:$0xff]  ;;  %v1756_v7 = vld [vmem:[#allocation8 + $0x1ec] ss:$16 sps:$4 sm:$0xff]  }
  0x71   :  { %916 = vmatprep.subr.bf16.mxu0 %v1700_v24  ;;  %998 = vmatprep.subr.bf16.mxu1 %v1702_v25  ;;  %v1754_v6 = vld [vmem:[#allocation8 + $0x1e4] ss:$16 sps:$4 sm:$0xff]   ;;  %v106_v8 = vadd.f32 %v102_v5, %v98_v3  ;;  %v1758_v9 = vld [vmem:[#allocation8 + $0x1e0] ss:$16 sps:$4 sm:$0xff]   ;;  %v1759_v10 = vld [vmem:[#allocation8 + $0x1e8] ss:$16 sps:$4 sm:$0xff]   ;;  %p2006_p2 = pnand %p2005_p1, %p1999_p12 }
  0x72   :  { %936 = vmatprep.mubr.bf16.mxu0 %v111_v57  ;;  %1018 = vmatprep.mubr.bf16.mxu1 %v111_v57  ;;  %v1762_v11 = vld [vmem:[#allocation8 + $0x204] ss:$16 sps:$4 sm:$0xff]   ;;  %v1765_v12 = vld [vmem:[#allocation8 + $0x20c] ss:$16 sps:$4 sm:$0xff]   ;;  %v1760_v14 = vld [vmem:[#allocation8 + $0x200] ss:$16 sps:$4 sm:$0xff]  }
  0x73   :  { %v110_v13 = vpack.c.bf16 %v106_v8, %v106_v8  ;;  %v1763_v15 = vld [vmem:[#allocation8 + $0x208] ss:$16 sps:$4 sm:$0xff]   ;;  %v1768_v16 = vld [vmem:[#allocation8 + $0x224] ss:$16 sps:$4 sm:$0xff]   ;;  %v1771_v17 = vld [vmem:[#allocation8 + $0x22c] ss:$16 sps:$4 sm:$0xff]  }
  0x74   :  { %917 = vmatpush1.bf16.msra.mxu0 %v1704_v26  ;;  %999 = vmatpush1.bf16.msra.mxu1 %v1705_v27  ;;  %v1766_v18 = vld [vmem:[#allocation8 + $0x220] ss:$16 sps:$4 sm:$0xff]   ;;  %v1769_v19 = vld [vmem:[#allocation8 + $0x228] ss:$16 sps:$4 sm:$0xff]   ;;  %v1774_v20 = vld [vmem:[#allocation8 + $0x244] ss:$16 sps:$4 sm:$0xff]  }
  0x75   :  { %918 = vmatprep.subr.bf16.mxu0 %v1706_v28  ;;  %1000 = vmatprep.subr.bf16.mxu1 %v1708_v29  ;;  %v1777_v21 = vld [vmem:[#allocation8 + $0x24c] ss:$16 sps:$4 sm:$0xff]   ;;  %v1772_v22 = vld [vmem:[#allocation8 + $0x240] ss:$16 sps:$4 sm:$0xff]   ;;  %v1775_v23 = vld [vmem:[#allocation8 + $0x248] ss:$16 sps:$4 sm:$0xff]  }
  0x76   :  { %v1780_v24 = vld [vmem:[#allocation8 + $0x264] ss:$16 sps:$4 sm:$0xff]   ;;  %v1783_v25 = vld [vmem:[#allocation8 + $0x26c] ss:$16 sps:$4 sm:$0xff]   ;;  %v1778_v26 = vld [vmem:[#allocation8 + $0x260] ss:$16 sps:$4 sm:$0xff]  }
  0x77   :  { %v1781_v27 = vld [vmem:[#allocation8 + $0x268] ss:$16 sps:$4 sm:$0xff]   ;;  %v1786_v28 = vld [vmem:[#allocation8 + $0x284] ss:$16 sps:$4 sm:$0xff]   ;;  %v1789_v29 = vld [vmem:[#allocation8 + $0x28c] ss:$16 sps:$4 sm:$0xff]  }
  0x78   :  { %919 = vmatpush1.bf16.msra.mxu0 %v1710_v30  ;;  %1001 = vmatpush1.bf16.msra.mxu1 %v1711_v31  ;;  %v1784_v30 = vld [vmem:[#allocation8 + $0x280] ss:$16 sps:$4 sm:$0xff]   ;;  %v1787_v31 = vld [vmem:[#allocation8 + $0x288] ss:$16 sps:$4 sm:$0xff]   ;;  %v1810_v49 = vld [vmem:[#allocation8 + $0x304] ss:$16 sps:$4 sm:$0xff]  }
  0x79   :  { %920 = vmatprep.subr.bf16.mxu0 %v1712_v32  ;;  %1002 = vmatprep.subr.bf16.mxu1 %v1714_v33  ;;  %v1792_v32 = vld [vmem:[#allocation8 + $0x2a4] ss:$16 sps:$4 sm:$0xff]   ;;  %v1795_v33 = vld [vmem:[#allocation8 + $0x2ac] ss:$16 sps:$4 sm:$0xff]   ;;  %v1805_v48 = vld [vmem:[#allocation8 + $0x2e8] ss:$16 sps:$4 sm:$0xff]  }
  0x7a   :  { %v1808_v52 = vld [vmem:[#allocation8 + $0x300] ss:$16 sps:$4 sm:$0xff]   ;;  %v1816_v54 = vld [vmem:[#allocation8 + $0x324] ss:$16 sps:$4 sm:$0xff]   ;;  %v1817_v57 = vld [vmem:[#allocation8 + $0x328] ss:$16 sps:$4 sm:$0xff]  }
  0x7b   :  { %v1828_v62 = vld [vmem:[#allocation8 + $0x364] ss:$16 sps:$4 sm:$0xff]   ;;  %v1831_v63 = vld [vmem:[#allocation8 + $0x36c] ss:$16 sps:$4 sm:$0xff]   ;;  %v1835_v5 = vld [vmem:[#allocation8 + $0x388] ss:$16 sps:$4 sm:$0xff]  }
  0x7c   :  { %921 = vmatpush1.bf16.msra.mxu0 %v1716_v34  ;;  %1003 = vmatpush1.bf16.msra.mxu1 %v1717_v35  ;;  %v1790_v34 = vld [vmem:[#allocation8 + $0x2a0] ss:$16 sps:$4 sm:$0xff]   ;;  %v1793_v35 = vld [vmem:[#allocation8 + $0x2a8] ss:$16 sps:$4 sm:$0xff]   ;;  %v1837_v3 = vld [vmem:[#allocation8 + $0x38c] ss:$16 sps:$4 sm:$0xff]  }
  0x7d   :  { %922 = vmatprep.subr.bf16.mxu0 %v1718_v36  ;;  %1004 = vmatprep.subr.bf16.mxu1 %v1720_v37  ;;  %v1798_v36 = vld [vmem:[#allocation8 + $0x2c4] ss:$16 sps:$4 sm:$0xff]   ;;  %v1801_v37 = vld [vmem:[#allocation8 + $0x2cc] ss:$16 sps:$4 sm:$0xff]   ;;  %v1838_v8 = vld [vmem:[#allocation8 + $0x3a0] ss:$16 sps:$4 sm:$0xff]  }
  0x80   :  { %923 = vmatpush1.bf16.msra.mxu0 %v1722_v38  ;;  %1005 = vmatpush1.bf16.msra.mxu1 %v1723_v39  ;;  %v1796_v38 = vld [vmem:[#allocation8 + $0x2c0] ss:$16 sps:$4 sm:$0xff]   ;;  %v93_v39 = vld [vmem:[#allocation2 + $0x18] sm:$0xff] }
  0x81   :  { %924 = vmatprep.subr.bf16.mxu0 %v1724_v40  ;;  %1006 = vmatprep.subr.bf16.mxu1 %v1726_v41  ;;  %v97_v40 = vld [vmem:[#allocation5 + $0x18] sm:$0xff] }
  0x82   :  { %v1799_v41 = vld [vmem:[#allocation8 + $0x2c8] ss:$16 sps:$4 sm:$0xff]  }
  0x84   :  { %925 = vmatpush1.bf16.msra.mxu0 %v1728_v42  ;;  %1007 = vmatpush1.bf16.msra.mxu1 %v1729_v43  ;;  %v1804_v42 = vld [vmem:[#allocation8 + $0x2e4] ss:$16 sps:$4 sm:$0xff]   ;;  %v101_v43 = vadd.f32 %v97_v40, %v93_v39  ;;  %v1871_v39 = vld [vmem:[#allocation10 + $0x98] sm:$0xff]  }
  0x85   :  { %926 = vmatprep.subr.bf16.mxu0 %v1730_v44  ;;  %1008 = vmatprep.subr.bf16.mxu1 %v1732_v45  ;;  %v105_v44 = vld [vmem:[#allocation7 + $0x18] sm:$0xff]  ;;  %v1872_v40 = vld [vmem:[#allocation10 + $0x60] sm:$0xff]  }
  0x86   :  { %v1807_v45 = vld [vmem:[#allocation8 + $0x2ec] ss:$16 sps:$4 sm:$0xff]   ;;  %v109_v47 = vadd.f32 %v105_v44, %v101_v43  ;;  %v1875_v43 = vld [vmem:[#allocation10 + $0xa0] sm:$0xff]  }
  0x87   :  { %v1876_v44 = vld [vmem:[#allocation10 + $0x68] sm:$0xff]  }
  0x88   :  { %927 = vmatpush1.bf16.msra.mxu0 %v1734_v46  ;;  %1009 = vmatpush1.bf16.msra.mxu1 %v1735_v50  ;;  %v1802_v46 = vld [vmem:[#allocation8 + $0x2e0] ss:$16 sps:$4 sm:$0xff]   ;;  %v113_v50 = vpack.c.bf16 %v109_v47, %v109_v47  ;;  %v1879_v47 = vld [vmem:[#allocation10 + $0xa8] sm:$0xff]  }
  0x89   :  { %928 = vmatprep.subr.bf16.mxu0 %v1736_v51  ;;  %1010 = vmatprep.subr.bf16.mxu1 %v1738_v53  ;;  %v1813_v51 = vld [vmem:[#allocation8 + $0x30c] ss:$16 sps:$4 sm:$0xff]   ;;  %v1811_v53 = vld [vmem:[#allocation8 + $0x308] ss:$16 sps:$4 sm:$0xff]  }
  0x8c   :  { %929 = vmatpush1.bf16.msra.mxu0 %v1740_v55  ;;  %1011 = vmatpush1.bf16.msra.mxu1 %v1741_v56  ;;  %v1819_v55 = vld [vmem:[#allocation8 + $0x32c] ss:$16 sps:$4 sm:$0xff]   ;;  %v1814_v56 = vld [vmem:[#allocation8 + $0x320] ss:$16 sps:$4 sm:$0xff]  }
  0x8d   :  { %930 = vmatprep.subr.bf16.mxu0 %v1742_v58  ;;  %1012 = vmatprep.subr.bf16.mxu1 %v1744_v59  ;;  %v1822_v58 = vld [vmem:[#allocation8 + $0x344] ss:$16 sps:$4 sm:$0xff]   ;;  %v1825_v59 = vld [vmem:[#allocation8 + $0x34c] ss:$16 sps:$4 sm:$0xff]  }
  0x90   :  { %931 = vmatpush1.bf16.msra.mxu0 %v1746_v60  ;;  %1013 = vmatpush1.bf16.msra.mxu1 %v1747_v61  ;;  %v1820_v60 = vld [vmem:[#allocation8 + $0x340] ss:$16 sps:$4 sm:$0xff]   ;;  %v1823_v61 = vld [vmem:[#allocation8 + $0x348] ss:$16 sps:$4 sm:$0xff]  }
  0x91   :  { %932 = vmatprep.subr.bf16.mxu0 %v1748_v0  ;;  %1014 = vmatprep.subr.bf16.mxu1 %v1750_v1  ;;  %v1826_v0 = vld [vmem:[#allocation8 + $0x360] ss:$16 sps:$4 sm:$0xff]   ;;  %v1829_v1 = vld [vmem:[#allocation8 + $0x368] ss:$16 sps:$4 sm:$0xff]  }
  0x94   :  { %933 = vmatpush1.bf16.msra.mxu0 %v1752_v2  ;;  %1015 = vmatpush1.bf16.msra.mxu1 %v1753_v4  ;;  %v1834_v2 = vld [vmem:[#allocation8 + $0x384] ss:$16 sps:$4 sm:$0xff]   ;;  %v1832_v4 = vld [vmem:[#allocation8 + $0x380] ss:$16 sps:$4 sm:$0xff]  }
  0x95   :  { %934 = vmatprep.subr.bf16.mxu0 %v1754_v6  ;;  %1016 = vmatprep.subr.bf16.mxu1 %v1756_v7  ;;  %v1840_v6 = vld [vmem:[#allocation8 + $0x3a4] ss:$16 sps:$4 sm:$0xff]   ;;  %v1843_v7 = vld [vmem:[#allocation8 + $0x3ac] ss:$16 sps:$4 sm:$0xff]  }
  0x98   :  { %935 = vmatpush1.bf16.msra.mxu0 %v1758_v9  ;;  %1017 = vmatpush1.bf16.msra.mxu1 %v1759_v10  ;;  %v1841_v9 = vld [vmem:[#allocation8 + $0x3a8] ss:$16 sps:$4 sm:$0xff]   ;;  %v92_v10 = vld [vmem:[#allocation2 + $0x10] sm:$0xff] }
  0x99   :  { %945 = vmatprep.subr.bf16.mxu0 %v1762_v11  ;;  %1027 = vmatprep.subr.bf16.mxu1 %v1765_v12  ;;  %v96_v11 = vld [vmem:[#allocation5 + $0x10] sm:$0xff] }
  0x9a   :  { %v1846_v12 = vld [vmem:[#allocation8 + $0x3c4] ss:$16 sps:$4 sm:$0xff]  }
  0x9b   :  { %937 = vmatmul.mubr.bf16.vlgmr.msra.gmra.mrb[0].mxu0 %v110_v13  ;;  %1019 = vmatmul.mubr.bf16.vlgmr.msra.gmra.mrb[0].mxu1 %v110_v13  ;;  %v1849_v13 = vld [vmem:[#allocation8 + $0x3cc] ss:$16 sps:$4 sm:$0xff]  }
  0x9c   :  { %946 = vmatpush1.bf16.msra.mxu0 %v1760_v14  ;;  %1028 = vmatpush1.bf16.msra.mxu1 %v1763_v15  ;;  %v100_v14 = vadd.f32 %v96_v11, %v92_v10  ;;  %v1844_v15 = vld [vmem:[#allocation8 + $0x3c0] ss:$16 sps:$4 sm:$0xff]  }
  0x9d   :  { %947 = vmatprep.subr.bf16.mxu0 %v1768_v16  ;;  %1029 = vmatprep.subr.bf16.mxu1 %v1771_v17  ;;  %v1847_v16 = vld [vmem:[#allocation8 + $0x3c8] ss:$16 sps:$4 sm:$0xff]   ;;  %v104_v17 = vld [vmem:[#allocation7 + $0x10] sm:$0xff] }
  0x9e   :  { %977 = vmatprep.mubr.bf16.mxu0 %v113_v50  ;;  %1059 = vmatprep.mubr.bf16.mxu1 %v113_v50  ;;  %v1882_v50 = vld [vmem:[#allocation10 + $0x30] sm:$0xff]  }
  0xa0   :  { %948 = vmatpush1.bf16.msra.mxu0 %v1766_v18  ;;  %1030 = vmatpush1.bf16.msra.mxu1 %v1769_v19  ;;  %v1852_v18 = vld [vmem:[#allocation8 + $0x3e4] ss:$16 sps:$4 sm:$0xff]   ;;  %v1855_v19 = vld [vmem:[#allocation8 + $0x3ec] ss:$16 sps:$4 sm:$0xff]  }
  0xa1   :  { %949 = vmatprep.subr.bf16.mxu0 %v1774_v20  ;;  %1031 = vmatprep.subr.bf16.mxu1 %v1777_v21  ;;  %v108_v20 = vadd.f32 %v104_v17, %v100_v14  ;;  %v1850_v21 = vld [vmem:[#allocation8 + $0x3e0] ss:$16 sps:$4 sm:$0xff]  }
  0xa4   :  { %950 = vmatpush1.bf16.msra.mxu0 %v1772_v22  ;;  %1032 = vmatpush1.bf16.msra.mxu1 %v1775_v23  ;;  %v1853_v22 = vld [vmem:[#allocation8 + $0x3e8] ss:$16 sps:$4 sm:$0xff]   ;;  %v1856_v23 = vld [vmem:[#allocation10 + $0x40] sm:$0xff]  }
  0xa5   :  { %951 = vmatprep.subr.bf16.mxu0 %v1780_v24  ;;  %1033 = vmatprep.subr.bf16.mxu1 %v1783_v25  ;;  %v1857_v24 = vld [vmem:[#allocation10 + $0xc0] sm:$0xff]   ;;  %v112_v25 = vpack.c.bf16 %v108_v20, %v108_v20 }
  0xa8   :  { %952 = vmatpush1.bf16.msra.mxu0 %v1778_v26  ;;  %1034 = vmatpush1.bf16.msra.mxu1 %v1781_v27  ;;  %v1858_v26 = vld [vmem:[#allocation10] sm:$0xff]  }
  0xa9   :  { %953 = vmatprep.subr.bf16.mxu0 %v1786_v28  ;;  %1035 = vmatprep.subr.bf16.mxu1 %v1789_v29  ;;  %v1859_v27 = vld [vmem:[#allocation10 + $0x80] sm:$0xff]   ;;  %v1860_v28 = vld [vmem:[#allocation10 + $0x48] sm:$0xff]  }
  0xaa   :  { %v1861_v29 = vld [vmem:[#allocation10 + $0xc8] sm:$0xff]  }
  0xac   :  { %954 = vmatpush1.bf16.msra.mxu0 %v1784_v30  ;;  %1036 = vmatpush1.bf16.msra.mxu1 %v1787_v31  ;;  %v1862_v30 = vld [vmem:[#allocation10 + $0x8] sm:$0xff]  }
  0xad   :  { %955 = vmatprep.subr.bf16.mxu0 %v1792_v32  ;;  %1037 = vmatprep.subr.bf16.mxu1 %v1795_v33  ;;  %v1863_v31 = vld [vmem:[#allocation10 + $0x88] sm:$0xff]   ;;  %v1864_v32 = vld [vmem:[#allocation10 + $0x50] sm:$0xff]  }
  0xae   :  { %v1865_v33 = vld [vmem:[#allocation10 + $0xd0] sm:$0xff]  }
  0xb0   :  { %956 = vmatpush1.bf16.msra.mxu0 %v1790_v34  ;;  %1038 = vmatpush1.bf16.msra.mxu1 %v1793_v35  ;;  %v1866_v34 = vld [vmem:[#allocation10 + $0x10] sm:$0xff]  }
  0xb1   :  { %957 = vmatprep.subr.bf16.mxu0 %v1798_v36  ;;  %1039 = vmatprep.subr.bf16.mxu1 %v1801_v37  ;;  %v1867_v35 = vld [vmem:[#allocation10 + $0x90] sm:$0xff]   ;;  %v1868_v36 = vld [vmem:[#allocation10 + $0x58] sm:$0xff]  }
  0xb2   :  { %v1869_v37 = vld [vmem:[#allocation10 + $0xd8] sm:$0xff]  }
  0xb4   :  { %958 = vmatpush1.bf16.msra.mxu0 %v1796_v38  ;;  %1040 = vmatpush1.bf16.msra.mxu1 %v1799_v41  ;;  %v1870_v38 = vld [vmem:[#allocation10 + $0x18] sm:$0xff]   ;;  %v1873_v41 = vld [vmem:[#allocation10 + $0xe0] sm:$0xff]  }
  0xb5   :  { %959 = vmatprep.subr.bf16.mxu0 %v1804_v42  ;;  %1041 = vmatprep.subr.bf16.mxu1 %v1807_v45  ;;  %v1874_v42 = vld [vmem:[#allocation10 + $0x20] sm:$0xff]   ;;  %v1877_v45 = vld [vmem:[#allocation10 + $0xe8] sm:$0xff]  }
  0xb8   :  { %960 = vmatpush1.bf16.msra.mxu0 %v1802_v46  ;;  %1042 = vmatpush1.bf16.msra.mxu1 %v1805_v48  ;;  %v1878_v46 = vld [vmem:[#allocation10 + $0x28] sm:$0xff]   ;;  %v1880_v48 = vld [vmem:[#allocation10 + $0x70] sm:$0xff]  }
  0xb9   :  { %961 = vmatprep.subr.bf16.mxu0 %v1810_v49  ;;  %1043 = vmatprep.subr.bf16.mxu1 %v1813_v51  ;;  %v1881_v49 = vld [vmem:[#allocation10 + $0xf0] sm:$0xff]  }
  0xba   :  { %v1883_v51 = vld [vmem:[#allocation10 + $0xb0] sm:$0xff]  }
  0xbc   :  { %962 = vmatpush1.bf16.msra.mxu0 %v1808_v52  ;;  %1044 = vmatpush1.bf16.msra.mxu1 %v1811_v53  ;;  %v1884_v52 = vld [vmem:[#allocation10 + $0x78] sm:$0xff]  }
  0xbd   :  { %963 = vmatprep.subr.bf16.mxu0 %v1816_v54  ;;  %1045 = vmatprep.subr.bf16.mxu1 %v1819_v55  ;;  %v1885_v53 = vld [vmem:[#allocation10 + $0xf8] sm:$0xff]  }
  0xbe   :  { %v1886_v54 = vld [vmem:[#allocation10 + $0x38] sm:$0xff]  }
  0xbf   :  { %v1887_v55 = vld [vmem:[#allocation10 + $0xb8] sm:$0xff]  }
  0xc0   :  { %964 = vmatpush1.bf16.msra.mxu0 %v1814_v56  ;;  %1046 = vmatpush1.bf16.msra.mxu1 %v1817_v57  ;;  %v244_v56 = vlaneseq }
  0xc1   :  { %965 = vmatprep.subr.bf16.mxu0 %v1822_v58  ;;  %1047 = vmatprep.subr.bf16.mxu1 %v1825_v59 }
  0xc2   :  { %v245_v57 = vshrl.u32 %v244_v56, 7 }
  0xc4   :  { %966 = vmatpush1.bf16.msra.mxu0 %v1820_v60  ;;  %1048 = vmatpush1.bf16.msra.mxu1 %v1823_v61  ;;  %v246_v58 = vsub.s32 0, %v245_v57  ;;  %v254_v59 = vsub.s32 2, %v245_v57  ;;  %v242_v60 = vld [vmem:[%s2167_s4] sm:$0xf]  ;;  %v250_v61 = vsub.s32 1, %v245_v57 }
  0xc5   :  { %967 = vmatprep.subr.bf16.mxu0 %v1828_v62  ;;  %1049 = vmatprep.subr.bf16.mxu1 %v1831_v63  ;;  %v258_v62 = vsub.s32 3, %v245_v57 }
  0xc6   :  { %v247_v63 = vrot.slane %v242_v60, %v246_v58 }
  0xc8   :  { %968 = vmatpush1.bf16.msra.mxu0 %v1826_v0  ;;  %1050 = vmatpush1.bf16.msra.mxu1 %v1829_v1  ;;  %v255_v0 = vrot.slane %v242_v60, %v254_v59  ;;  %v251_v1 = vrot.slane %v242_v60, %v250_v61 }
  0xc9   :  { %969 = vmatprep.subr.bf16.mxu0 %v1834_v2  ;;  %1051 = vmatprep.subr.bf16.mxu1 %v1837_v3  ;;  %v259_v2 = vrot.slane %v242_v60, %v258_v62 }
  0xcc   :  { %970 = vmatpush1.bf16.msra.mxu0 %v1832_v4  ;;  %1052 = vmatpush1.bf16.msra.mxu1 %v1835_v5 }
  0xcd   :  { %971 = vmatprep.subr.bf16.mxu0 %v1840_v6  ;;  %1053 = vmatprep.subr.bf16.mxu1 %v1843_v7 }
  0xd0   :  { %972 = vmatpush1.bf16.msra.mxu0 %v1838_v8  ;;  %1054 = vmatpush1.bf16.msra.mxu1 %v1841_v9 }
  0xd1   :  { %973 = vmatprep.subr.bf16.mxu0 %v1846_v12  ;;  %1055 = vmatprep.subr.bf16.mxu1 %v1849_v13 }
  0xd4   :  { %974 = vmatpush1.bf16.msra.mxu0 %v1844_v15  ;;  %1056 = vmatpush1.bf16.msra.mxu1 %v1847_v16 }
  0xd5   :  { %975 = vmatprep.subr.bf16.mxu0 %v1852_v18  ;;  %1057 = vmatprep.subr.bf16.mxu1 %v1855_v19 }
  0xd8   :  { %976 = vmatpush1.bf16.msra.mxu0 %v1850_v21  ;;  %1058 = vmatpush1.bf16.msra.mxu1 %v1853_v22 }
  0xd9   :  { %1598 = vmatprep.subr.bf16.mxu0 %v1856_v23  ;;  %1620 = vmatprep.subr.bf16.mxu1 %v1857_v24 }
  0xdb   :  { %978 = vmatmul.mubr.bf16.vlgmr.msra.gmra.mrb[0].mxu0 %v112_v25  ;;  %1060 = vmatmul.mubr.bf16.vlgmr.msra.gmra.mrb[0].mxu1 %v112_v25  ;;  %v1565_v25 = vld [vmem:[%s2169_s6] ss:$0 sm:$0xff] }
  0xdc   :  { %1599 = vmatpush3.bf16.msra.mxu0 %v1858_v26  ;;  %1621 = vmatpush3.bf16.msra.mxu1 %v1859_v27 }
  0xdd   :  { %1600 = vmatprep.subr.bf16.mxu0 %v1860_v28  ;;  %1622 = vmatprep.subr.bf16.mxu1 %v1861_v29 }
  0xe0   :  { %1601 = vmatpush3.bf16.msra.mxu0 %v1862_v30  ;;  %1623 = vmatpush3.bf16.msra.mxu1 %v1863_v31 }
  0xe1   :  { %1602 = vmatprep.subr.bf16.mxu0 %v1864_v32  ;;  %1624 = vmatprep.subr.bf16.mxu1 %v1865_v33 }
  0xe4   :  { %1603 = vmatpush3.bf16.msra.mxu0 %v1866_v34  ;;  %1625 = vmatpush3.bf16.msra.mxu1 %v1867_v35 }
  0xe5   :  { %1604 = vmatprep.subr.bf16.mxu0 %v1868_v36  ;;  %1626 = vmatprep.subr.bf16.mxu1 %v1869_v37 }
  0xe8   :  { %1605 = vmatpush3.bf16.msra.mxu0 %v1870_v38  ;;  %1627 = vmatpush3.bf16.msra.mxu1 %v1871_v39 }
  0xe9   :  { %1606 = vmatprep.subr.bf16.mxu0 %v1872_v40  ;;  %1628 = vmatprep.subr.bf16.mxu1 %v1873_v41 }
  0xec   :  { %1607 = vmatpush3.bf16.msra.mxu0 %v1874_v42  ;;  %1629 = vmatpush3.bf16.msra.mxu1 %v1875_v43 }
  0xed   :  { %1608 = vmatprep.subr.bf16.mxu0 %v1876_v44  ;;  %1630 = vmatprep.subr.bf16.mxu1 %v1877_v45 }
  0xf0   :  { %1609 = vmatpush3.bf16.msra.mxu0 %v1878_v46  ;;  %1631 = vmatpush3.bf16.msra.mxu1 %v1879_v47 }
  0xf1   :  { %1610 = vmatprep.subr.bf16.mxu0 %v1880_v48  ;;  %1632 = vmatprep.subr.bf16.mxu1 %v1881_v49 }
  0xf4   :  { %1611 = vmatpush3.bf16.msra.mxu0 %v1882_v50  ;;  %1633 = vmatpush3.bf16.msra.mxu1 %v1883_v51 }
  0xf5   :  { %1612 = vmatprep.subr.bf16.mxu0 %v1884_v52  ;;  %1634 = vmatprep.subr.bf16.mxu1 %v1885_v53 }
  0xf8   :  { %1613 = vmatpush3.bf16.msra.mxu0 %v1886_v54  ;;  %1635 = vmatpush3.bf16.msra.mxu1 %v1887_v55 }
 0x1ae   :  { %v979_v3 = vpop.f32.mrb[0].mxu0  ;;  %v1061_v4 = vpop.f32.mrb[0].mxu1 }
 0x1af   :  { %v1642_v5 = vadd.f32 %v979_v3, %v247_v63  ;;  %v1644_v6 = vadd.f32 %v1061_v4, %v255_v0  ;;  %v981_v7 = vpop.f32.mrb[1].mxu0  ;;  %v1063_v8 = vpop.f32.mrb[1].mxu1 }
 0x1b0   :  { %v1643_v9 = vadd.f32 %v981_v7, %v251_v1  ;;  %v1645_v10 = vadd.f32 %v1063_v8, %v259_v2  ;;  %v983_v11 = vpop.f32.mrb[2].mxu0  ;;  %v1065_v12 = vpop.f32.mrb[2].mxu1 }
 0x1b1   :  { %v1068_v13 = vmax.f32 %v1642_v5, 0.0  ;;  %v1070_v14 = vmax.f32 %v1644_v6, 0.0  ;;  %v984_v15 = vpop.f32.mrb[3].mxu0  ;;  %v1066_v16 = vpop.f32.mrb[3].mxu1 }
 0x1b2   :  { %v1069_v17 = vmax.f32 %v1643_v9, 0.0  ;;  %v1071_v18 = vmax.f32 %v1645_v10, 0.0 }
 0x1b3   :  { %v1072_v21 = vpack.c.bf16 %v1068_v13, %v1068_v13  ;;  %v1074_v22 = vpack.c.bf16 %v1070_v14, %v1070_v14 }
 0x1b4   :  { %v1073_v19 = vpack.c.bf16 %v1069_v17, %v1069_v17  ;;  %v1075_v20 = vpack.c.bf16 %v1071_v18, %v1071_v18 }
 0x1b6   :  { %1371 = vmatprep.mubr.bf16.mxu0 %v1073_v19  ;;  %1411 = vmatprep.mubr.bf16.mxu1 %v1075_v20 }
 0x1b7   :  { %1372 = vmatmul.mubr.bf16.vlgmr.msra.gmra.mrb[4].mxu0 %v1072_v21  ;;  %1412 = vmatmul.mubr.bf16.vlgmr.msra.gmra.mrb[4].mxu1 %v1074_v22 }
 0x28a   :  { %v1614_v23 = vpop.f32.mrb[4].mxu0  ;;  %v1636_v24 = vpop.f32.mrb[4].mxu1 }
 0x28b   :  { %v1615_v26 = vpop.f32.mrb[5].mxu0  ;;  %v1637_v27 = vpop.f32.mrb[5].mxu1 }
 0x28c   :  { %v1616_v28 = vadd.f32 %v1615_v26, %v1614_v23  ;;  %v1638_v29 = vadd.f32 %v1637_v27, %v1636_v24  ;;  %v1617_v30 = vpop.f32.mrb[6].mxu0  ;;  %v1639_v31 = vpop.f32.mrb[6].mxu1 }
 0x28d   :  { %v1618_v32 = vpop.f32.mrb[7].mxu0  ;;  %v1640_v33 = vpop.f32.mrb[7].mxu1 }
 0x28e   :  { %v1374_v34 = vadd.f32 %v1616_v28, %v1565_v25 }
 0x290   :  { %v1414_v35 = vadd.f32 %v1638_v29, %v1374_v34 }
 0x292   :  { %1419 = vst [vmem:[#allocation11] sm:$0xff] %v1414_v35 }
 0x293   :  { %2009 = shalt.err (!%p2006_p2)
}
 0x294   :  { %s2010_s19 = scalar_lea.hbm %s2170_s7, 128 }
 0x295   :  { %p2011_p3 = scmp.ne.s32.totalorder %s2170_s7, %s2010_s19  ;;  %p2014_p4 = scmp.lt.u32.totalorder %s2010_s19, %s2170_s7 }
 0x297   :  { %p2016_p5 = pnand %p2014_p4, %p2011_p3 }
 0x299   :  { %2019 = shalt.err (!%p2016_p5)
}
 0x29a   :  { %1429 = dma.vmem_to_hbm [thread:$0]  %s1427_s16, 128, %s2170_s7, [#allocation4]  }
 0x29b   :  { %2026 = dma.done.wait [#allocation4], 128  }
 0x29c   :  { %2027 = vsyncadd [#allocation4], 4294967168 }
 0x29d   :  { %1433 = vsyncpa [#allocation3], 1 }
 0x29e   :  { %1434 = vsyncpa [#allocation6], 1 }
 0x29f   :  { %1435 = vsyncpa [#allocation9], 1 }
 0x2a0   :  { %1436 = vsyncpa [#allocation4], 1 }

</bundles_post_ra>
